<compile_context>
chip_gen: v7x
topology: tpu7x:2x2x1
jax: 0.10.0
libtpu: 0.0.40
codegen_flags: <defaults>
</compile_context>

<pallas_src>
import jax
import jax.numpy as jnp
import numpy as np
from jax.experimental import pallas as pl
from jax.experimental.pallas import tpu as pltpu

KH = KW = 3  # 3x3 conv, stride 1, padding 1


def _tap_masks(H, W):
    """Per-tap validity masks (zero-padding halo) over the flattened H*W axis."""
    HW = H * W
    h = np.arange(H)[:, None]
    w = np.arange(W)[None, :]
    masks = np.zeros((KH * KW, 1, HW), np.float32)
    for kh in range(KH):
        for kw in range(KW):
            dh, dw = kh - 1, kw - 1
            valid = ((h + dh >= 0) & (h + dh < H) &
                     (w + dw >= 0) & (w + dw < W))
            masks[kh * KW + kw, 0, :] = valid.reshape(HW).astype(np.float32)
    return jnp.asarray(masks)


def _make_kernel(W):
    """Conv3x3 + BN(eval) + ReLU on one image, spatial flattened into lanes."""

    def kernel(x_ref, w_ref, scale_ref, shift_ref, mask_ref, out_ref):
        # x_ref    : (1, CI, H*W) f32      w_ref : (CO, KH*KW*CI) bf16
        # scale/shift : (CO, 1) f32        mask_ref : (KH*KW, 1, H*W) f32
        # out_ref  : (1, CO, H*W) f32
        x = x_ref[0]                                    # (CI, HW) f32
        HW = x.shape[1]

        # Build the im2col matrix with lane rolls (XLU) + halo masks (VPU).
        slabs = []
        for kh in range(KH):
            for kw in range(KW):
                dh, dw = kh - 1, kw - 1
                s = dh * W + dw                          # flat source offset
                rolled = x if s == 0 else pltpu.roll(x, shift=(-s) % HW, axis=1)
                if dh == 0 and dw == 0:
                    slabs.append(rolled)
                else:
                    slabs.append(rolled * mask_ref[kh * KW + kw])
        xcol = jnp.concatenate(slabs, axis=0).astype(jnp.bfloat16)  # (9*CI, HW)

        # Single MXU matmul, bf16 operands, f32 accumulation.
        acc = jnp.dot(w_ref[...], xcol,
                      preferred_element_type=jnp.float32)           # (CO, HW)

        # BatchNorm (eval, with conv bias folded into shift) + ReLU, f32.
        y = jnp.maximum(acc * scale_ref[...] + shift_ref[...], 0.0)
        out_ref[0] = y.astype(out_ref.dtype)

    return kernel


@jax.jit
def combined_forward(x_nchw, w_oihw, conv_bias, gamma, beta, run_mean, run_var,
                     eps=1e-5):
    N, CI, H, W = x_nchw.shape
    CO = w_oihw.shape[0]
    HW = H * W
    K9 = KH * KW * CI

    # Free reshape: NCHW -> (N, CI, H*W); spatial becomes the lane dimension.
    x_flat = x_nchw.reshape(N, CI, HW)

    # One-time tiny parameter prep (off the per-pixel hot path).
    # Weight rows ordered as (kh, kw, ci) to match the in-kernel im2col order.
    w_r = (jnp.transpose(w_oihw, (0, 2, 3, 1))
           .reshape(CO, K9).astype(jnp.bfloat16))
    scale = (gamma / jnp.sqrt(run_var + eps)).astype(jnp.float32)
    shift = ((conv_bias - run_mean) * scale + beta).astype(jnp.float32)
    scale = scale.reshape(CO, 1)
    shift = shift.reshape(CO, 1)
    masks = _tap_masks(H, W)                     # (9, 1, HW) f32 constants

    out = pl.pallas_call(
        _make_kernel(W),
        out_shape=jax.ShapeDtypeStruct((N, CO, HW), jnp.float32),
        grid=(N,),
        in_specs=[
            pl.BlockSpec((1, CI, HW), lambda n: (n, 0, 0)),
            pl.BlockSpec((CO, K9), lambda n: (0, 0)),
            pl.BlockSpec((CO, 1), lambda n: (0, 0)),
            pl.BlockSpec((CO, 1), lambda n: (0, 0)),
            pl.BlockSpec((KH * KW, 1, HW), lambda n: (0, 0, 0)),
        ],
        out_specs=pl.BlockSpec((1, CO, HW), lambda n: (n, 0, 0)),
        compiler_params=pltpu.CompilerParams(
            dimension_semantics=("parallel",)),
    )(x_flat, w_r, scale, shift, masks)

    # Free reshape back to NCHW (no transpose op).
    return out.reshape(N, CO, H, W)


def reference_forward(x_nchw, w_oihw, conv_bias, gamma, beta, mean, var,
                      eps=1e-5):
    z = jax.lax.conv_general_dilated(
        x_nchw, w_oihw, window_strides=(1, 1), padding=((1, 1), (1, 1)),
        dimension_numbers=("NCHW", "OIHW", "NCHW"))
    z = z + conv_bias[None, :, None, None]
    z = (z - mean[None, :, None, None]) / jnp.sqrt(
        var[None, :, None, None] + eps)
    z = z * gamma[None, :, None, None] + beta[None, :, None, None]
    return jnp.maximum(z, 0.0)


if __name__ == "__main__":
    key = jax.random.PRNGKey(0)
    expand = 2              # number of models combined
    c_in, c_out = 4, 8      # per-model Conv2d(4 -> 8, k=3, pad=1)
    N, Hs, Ws = 2, 16, 16
    CI, CO = expand * c_in, expand * c_out

    keys = jax.random.split(key, 16)
    # per-model deterministic parameters
    ws = [0.1 * jax.random.normal(keys[i], (c_out, c_in, KH, KW), jnp.float32)
          for i in range(expand)]
    bs = [0.1 * jax.random.normal(keys[2 + i], (c_out,), jnp.float32)
          for i in range(expand)]
    gammas = [1.0 + 0.1 * jax.random.normal(keys[4 + i], (c_out,), jnp.float32)
              for i in range(expand)]
    betas = [0.1 * jax.random.normal(keys[6 + i], (c_out,), jnp.float32)
             for i in range(expand)]
    means = [0.05 * jax.random.normal(keys[8 + i], (c_out,), jnp.float32)
             for i in range(expand)]
    vars_ = [0.5 + jnp.abs(jax.random.normal(keys[10 + i], (c_out,),
                                             jnp.float32))
             for i in range(expand)]

    # --- replicate conv2d_combine_fn (including its `ci_offset += ci_offset`
    #     bug: every model's input-channel block lands at column offset 0) ---
    w_comb = jnp.zeros((CO, CI, KH, KW), jnp.float32)
    b_comb = jnp.zeros((CO,), jnp.float32)
    co_off, ci_off = 0, 0
    for k in range(expand):
        w_comb = w_comb.at[co_off:co_off + c_out,
                           ci_off:ci_off + c_in].set(ws[k])
        b_comb = b_comb.at[co_off:co_off + c_out].set(bs[k])
        co_off += c_out
        ci_off += ci_off    # bug preserved from the reference implementation

    # --- replicate bn_combine_fn (channel-wise concat) ---
    gamma_c = jnp.concatenate(gammas)
    beta_c = jnp.concatenate(betas)
    mean_c = jnp.concatenate(means)
    var_c = jnp.concatenate(vars_)

    # input: NCHW with CI = expand * c_in channels (what the combined conv expects)
    x = jax.random.normal(keys[12], (N, CI, Hs, Ws), jnp.float32)

    out = combined_forward(x, w_comb, b_comb, gamma_c, beta_c, mean_c, var_c)
    out = jax.block_until_ready(out)

    ref = reference_forward(x, w_comb, b_comb, gamma_c, beta_c, mean_c, var_c)
    # Tolerance accounts for bf16 MXU operands (f32 accumulation + f32 epilogue).
    np.testing.assert_allclose(np.asarray(out), np.asarray(ref),
                               atol=1e-2, rtol=1e-2)
    print("KERNEL_OK")
</pallas_src>

<mosaic_0001>
module attributes {stable_mosaic.version = 11 : i64} {
  func.func @kernel(%arg0: i32, %arg1: memref<1x8x256xf32, #tpu.memory_space<vmem>>, %arg2: memref<16x72xbf16, #tpu.memory_space<vmem>>, %arg3: memref<16x1xf32, #tpu.memory_space<vmem>>, %arg4: memref<16x1xf32, #tpu.memory_space<vmem>>, %arg5: memref<9x1x256xf32, #tpu.memory_space<vmem>>, %arg6: memref<1x16x256xf32, #tpu.memory_space<vmem>>) attributes {dimension_semantics = [#tpu.dimension_semantics<parallel>], iteration_bounds = array<i64: 2>, scalar_prefetch = 0 : i64, scratch_operands = 0 : i64, tpu.core_type = #tpu.core_type<tc>, window_params = [{transform_indices = @transform_0, window_bounds = array<i64: 1, 8, 256>}, {pipeline_mode = #tpu.pipeline_mode<synchronous>, transform_indices = @transform_1, window_bounds = array<i64: 16, 72>}, {pipeline_mode = #tpu.pipeline_mode<synchronous>, transform_indices = @transform_2, window_bounds = array<i64: 16, 1>}, {pipeline_mode = #tpu.pipeline_mode<synchronous>, transform_indices = @transform_3, window_bounds = array<i64: 16, 1>}, {pipeline_mode = #tpu.pipeline_mode<synchronous>, transform_indices = @transform_4, window_bounds = array<i64: 9, 1, 256>}, {transform_indices = @transform_5, window_bounds = array<i64: 1, 16, 256>}]} {
    %c0 = arith.constant 0 : index
    %c0_0 = arith.constant 0 : index
    %c0_1 = arith.constant 0 : index
    %0 = vector.load %arg1[%c0, %c0_0, %c0_1] : memref<1x8x256xf32, #tpu.memory_space<vmem>>, vector<1x8x256xf32>
    %1 = vector.shape_cast %0 : vector<1x8x256xf32> to vector<8x256xf32>
    %c17_i32 = arith.constant 17 : i32
    %2 = tpu.dynamic_rotate %1 by %c17_i32 dim 1 : vector<8x256xf32>, i32 -> vector<8x256xf32>
    %c0_2 = arith.constant 0 : index
    %c0_3 = arith.constant 0 : index
    %c0_4 = arith.constant 0 : index
    %3 = vector.load %arg5[%c0_2, %c0_3, %c0_4] : memref<9x1x256xf32, #tpu.memory_space<vmem>>, vector<1x1x256xf32>
    %4 = vector.shape_cast %3 : vector<1x1x256xf32> to vector<1x256xf32>
    %5 = vector.broadcast %4 : vector<1x256xf32> to vector<8x256xf32>
    %6 = arith.mulf %2, %5 : vector<8x256xf32>
    %c16_i32 = arith.constant 16 : i32
    %7 = tpu.dynamic_rotate %1 by %c16_i32 dim 1 : vector<8x256xf32>, i32 -> vector<8x256xf32>
    %c1 = arith.constant 1 : index
    %c0_5 = arith.constant 0 : index
    %c0_6 = arith.constant 0 : index
    %8 = vector.load %arg5[%c1, %c0_5, %c0_6] : memref<9x1x256xf32, #tpu.memory_space<vmem>>, vector<1x1x256xf32>
    %9 = vector.shape_cast %8 : vector<1x1x256xf32> to vector<1x256xf32>
    %10 = vector.broadcast %9 : vector<1x256xf32> to vector<8x256xf32>
    %11 = arith.mulf %7, %10 : vector<8x256xf32>
    %c15_i32 = arith.constant 15 : i32
    %12 = tpu.dynamic_rotate %1 by %c15_i32 dim 1 : vector<8x256xf32>, i32 -> vector<8x256xf32>
    %c2 = arith.constant 2 : index
    %c0_7 = arith.constant 0 : index
    %c0_8 = arith.constant 0 : index
    %13 = vector.load %arg5[%c2, %c0_7, %c0_8] : memref<9x1x256xf32, #tpu.memory_space<vmem>>, vector<1x1x256xf32>
    %14 = vector.shape_cast %13 : vector<1x1x256xf32> to vector<1x256xf32>
    %15 = vector.broadcast %14 : vector<1x256xf32> to vector<8x256xf32>
    %16 = arith.mulf %12, %15 : vector<8x256xf32>
    %c1_i32 = arith.constant 1 : i32
    %17 = tpu.dynamic_rotate %1 by %c1_i32 dim 1 : vector<8x256xf32>, i32 -> vector<8x256xf32>
    %c3 = arith.constant 3 : index
    %c0_9 = arith.constant 0 : index
    %c0_10 = arith.constant 0 : index
    %18 = vector.load %arg5[%c3, %c0_9, %c0_10] : memref<9x1x256xf32, #tpu.memory_space<vmem>>, vector<1x1x256xf32>
    %19 = vector.shape_cast %18 : vector<1x1x256xf32> to vector<1x256xf32>
    %20 = vector.broadcast %19 : vector<1x256xf32> to vector<8x256xf32>
    %21 = arith.mulf %17, %20 : vector<8x256xf32>
    %c255_i32 = arith.constant 255 : i32
    %22 = tpu.dynamic_rotate %1 by %c255_i32 dim 1 : vector<8x256xf32>, i32 -> vector<8x256xf32>
    %c5 = arith.constant 5 : index
    %c0_11 = arith.constant 0 : index
    %c0_12 = arith.constant 0 : index
    %23 = vector.load %arg5[%c5, %c0_11, %c0_12] : memref<9x1x256xf32, #tpu.memory_space<vmem>>, vector<1x1x256xf32>
    %24 = vector.shape_cast %23 : vector<1x1x256xf32> to vector<1x256xf32>
    %25 = vector.broadcast %24 : vector<1x256xf32> to vector<8x256xf32>
    %26 = arith.mulf %22, %25 : vector<8x256xf32>
    %c241_i32 = arith.constant 241 : i32
    %27 = tpu.dynamic_rotate %1 by %c241_i32 dim 1 : vector<8x256xf32>, i32 -> vector<8x256xf32>
    %c6 = arith.constant 6 : index
    %c0_13 = arith.constant 0 : index
    %c0_14 = arith.constant 0 : index
    %28 = vector.load %arg5[%c6, %c0_13, %c0_14] : memref<9x1x256xf32, #tpu.memory_space<vmem>>, vector<1x1x256xf32>
    %29 = vector.shape_cast %28 : vector<1x1x256xf32> to vector<1x256xf32>
    %30 = vector.broadcast %29 : vector<1x256xf32> to vector<8x256xf32>
    %31 = arith.mulf %27, %30 : vector<8x256xf32>
    %c240_i32 = arith.constant 240 : i32
    %32 = tpu.dynamic_rotate %1 by %c240_i32 dim 1 : vector<8x256xf32>, i32 -> vector<8x256xf32>
    %c7 = arith.constant 7 : index
    %c0_15 = arith.constant 0 : index
    %c0_16 = arith.constant 0 : index
    %33 = vector.load %arg5[%c7, %c0_15, %c0_16] : memref<9x1x256xf32, #tpu.memory_space<vmem>>, vector<1x1x256xf32>
    %34 = vector.shape_cast %33 : vector<1x1x256xf32> to vector<1x256xf32>
    %35 = vector.broadcast %34 : vector<1x256xf32> to vector<8x256xf32>
    %36 = arith.mulf %32, %35 : vector<8x256xf32>
    %c239_i32 = arith.constant 239 : i32
    %37 = tpu.dynamic_rotate %1 by %c239_i32 dim 1 : vector<8x256xf32>, i32 -> vector<8x256xf32>
    %c8 = arith.constant 8 : index
    %c0_17 = arith.constant 0 : index
    %c0_18 = arith.constant 0 : index
    %38 = vector.load %arg5[%c8, %c0_17, %c0_18] : memref<9x1x256xf32, #tpu.memory_space<vmem>>, vector<1x1x256xf32>
    %39 = vector.shape_cast %38 : vector<1x1x256xf32> to vector<1x256xf32>
    %40 = vector.broadcast %39 : vector<1x256xf32> to vector<8x256xf32>
    %41 = arith.mulf %37, %40 : vector<8x256xf32>
    %42 = tpu.concatenate %6, %11, %16, %21, %1, %26, %31, %36, %41 in 0 : vector<8x256xf32>, vector<8x256xf32>, vector<8x256xf32>, vector<8x256xf32>, vector<8x256xf32>, vector<8x256xf32>, vector<8x256xf32>, vector<8x256xf32>, vector<8x256xf32> -> vector<72x256xf32>
    %43 = arith.truncf %42 : vector<72x256xf32> to vector<72x256xbf16>
    %c0_19 = arith.constant 0 : index
    %c0_20 = arith.constant 0 : index
    %44 = vector.load %arg2[%c0_19, %c0_20] : memref<16x72xbf16, #tpu.memory_space<vmem>>, vector<16x72xbf16>
    %cst = arith.constant dense<0.000000e+00> : vector<16x256xf32>
    %45 = tpu.matmul %44, %43, %cst {dimension_numbers = #tpu.dot_dimension_numbers<[1], [0], [0], [1], [0, 0, 1, 1], [], []>} : vector<16x72xbf16>, vector<72x256xbf16>, vector<16x256xf32> -> vector<16x256xf32>
    %c0_21 = arith.constant 0 : index
    %c0_22 = arith.constant 0 : index
    %46 = vector.load %arg3[%c0_21, %c0_22] : memref<16x1xf32, #tpu.memory_space<vmem>>, vector<16x1xf32>
    %47 = vector.broadcast %46 : vector<16x1xf32> to vector<16x256xf32>
    %48 = arith.mulf %45, %47 : vector<16x256xf32>
    %c0_23 = arith.constant 0 : index
    %c0_24 = arith.constant 0 : index
    %49 = vector.load %arg4[%c0_23, %c0_24] : memref<16x1xf32, #tpu.memory_space<vmem>>, vector<16x1xf32>
    %50 = vector.broadcast %49 : vector<16x1xf32> to vector<16x256xf32>
    %51 = arith.addf %48, %50 : vector<16x256xf32>
    %cst_25 = arith.constant 0.000000e+00 : f32
    %52 = vector.broadcast %cst_25 : f32 to vector<16x256xf32>
    %53 = arith.maximumf %51, %52 : vector<16x256xf32>
    %c0_26 = arith.constant 0 : index
    %c0_27 = arith.constant 0 : index
    %c0_28 = arith.constant 0 : index
    %54 = vector.load %arg6[%c0_26, %c0_27, %c0_28] : memref<1x16x256xf32, #tpu.memory_space<vmem>>, vector<1x16x256xf32>
    %55 = vector.shape_cast %54 : vector<1x16x256xf32> to vector<16x256xf32>
    %56 = vector.shape_cast %53 : vector<16x256xf32> to vector<1x16x256xf32>
    tpu.vector_store %arg6[%c0_26, %c0_27, %c0_28], %56 {strides = array<i32>} : memref<1x16x256xf32, #tpu.memory_space<vmem>>, vector<1x16x256xf32>,
    return
  }
  func.func @transform_0(%arg0: i32) -> (i32, i32, i32) {
    %c0_i32 = arith.constant 0 : i32
    %c0_i32_0 = arith.constant 0 : i32
    %c0_i32_1 = arith.constant 0 : i32
    return %arg0, %c0_i32, %c0_i32_0 : i32, i32, i32
  }
  func.func @transform_1(%arg0: i32) -> (i32, i32) {
    %c0_i32 = arith.constant 0 : i32
    %c0_i32_0 = arith.constant 0 : i32
    %c0_i32_1 = arith.constant 0 : i32
    return %c0_i32, %c0_i32_0 : i32, i32
  }
  func.func @transform_2(%arg0: i32) -> (i32, i32) {
    %c0_i32 = arith.constant 0 : i32
    %c0_i32_0 = arith.constant 0 : i32
    %c0_i32_1 = arith.constant 0 : i32
    return %c0_i32, %c0_i32_0 : i32, i32
  }
  func.func @transform_3(%arg0: i32) -> (i32, i32) {
    %c0_i32 = arith.constant 0 : i32
    %c0_i32_0 = arith.constant 0 : i32
    %c0_i32_1 = arith.constant 0 : i32
    return %c0_i32, %c0_i32_0 : i32, i32
  }
  func.func @transform_4(%arg0: i32) -> (i32, i32, i32) {
    %c0_i32 = arith.constant 0 : i32
    %c0_i32_0 = arith.constant 0 : i32
    %c0_i32_1 = arith.constant 0 : i32
    %c0_i32_2 = arith.constant 0 : i32
    return %c0_i32, %c0_i32_0, %c0_i32_1 : i32, i32, i32
  }
  func.func @transform_5(%arg0: i32) -> (i32, i32, i32) {
    %c0_i32 = arith.constant 0 : i32
    %c0_i32_0 = arith.constant 0 : i32
    %c0_i32_1 = arith.constant 0 : i32
    return %arg0, %c0_i32, %c0_i32_0 : i32, i32, i32
  }
}

</mosaic_0001>

<bundles_post_ra>
// kernel: combined_forward.1
= control target key start
LH: loop header
LB: loop body
LE: loop exit
PB: predicated region body
PF: predicated region fallthrough
CT: control target
= control target key end

     0   :  { %s661_s18 = smov 0   ;;  %s773_s0 = inlined_call_operand.vmem [shape: f32[2,8,256], index: 0, kind: input, shape index: {}]   ;;  %s774_s1 = inlined_call_operand.vmem [shape: bf16[16,72], index: 1, kind: input, shape index: {}]   ;;  %s775_s2 = inlined_call_operand.vmem [shape: f32[16,1], index: 2, kind: input, shape index: {}]   ;;  %s776_s3 = inlined_call_operand.vmem [shape: f32[16,1], index: 3, kind: input, shape index: {}]   ;;  %s777_s4 = inlined_call_operand.vmem [shape: f32[9,1,256], index: 4, kind: input, shape index: {}]   ;;  %s778_s5 = inlined_call_operand.vmem [shape: f32[2,16,256], index: 5, kind: output, shape index: {}]  }
   0x1 LB: > { %s571_s19 = sadd.s32 4294967295, %s620_s18   ;;  %p575_p0 = scmp.ge.s32.totalorder %s620_s18, 1  ;;  %s620_s18 = sphi %s661_s18, %s15_s18  }
   0x2   : > { %p187_p1 = scmp.lt.s32.totalorder %s620_s18, 3 }
   0x4   : > { %p188_p2 = pnand %p575_p0, %p187_p1 }
   0x5   : > { %p215_p3 = scmp.lt.s32.totalorder (!%p188_p2), %s571_s19, 1  ;;  %s622_s24 = smov (!%p188_p2), 16   ;;  %v628_v2 = vmov (!%p188_p2), 0   ;;  %v477_v3 = vld [vmem:[%s775_s2 + $0x8] sm:$0xff] (!%p188_p2)  ;;  %v476_v4 = vld [vmem:[%s775_s2] sm:$0xff] (!%p188_p2)  ;;  %v232_v7 = vlaneseq (!%p188_p2)  ;;  %vm426_vm8 = vcmask (!%p188_p2), 1043456  }
   0x6   : > { %191 = sbr.rel (%p188_p2) target bundleno = 391 (0x187), region = 40  ;;  %s623_s25 = smov (!%p188_p2), 17   ;;  %465 = vmatprep.mubr.bf16.mxu0 (!%p188_p2), %v628_v2  ;;  %612 = vset.pattern.permute.xlu1 (!%p188_p2), %v628_v2  ;;  %v492_v5 = vld [vmem:[%s776_s3] sm:$0xff] (!%p188_p2)  ;;  %v493_v6 = vld [vmem:[%s776_s3 + $0x8] sm:$0xff] (!%p188_p2)  ;;  %vm422_vm9 = vcmask (!%p188_p2), 588800  }
   0x7   : > { %s624_s26 = smov (!%p188_p2), 15   ;;  %s625_s27 = smov (!%p188_p2), 1   ;;  %611 = vset.pattern.permute.xlu0 (!%p188_p2), %v628_v2  ;;  %v240_v8 = vshrl.u32 (!%p188_p2), %v232_v7, 7  ;;  %v707_v9 = vand.u32 (!%p188_p2), 127, %v232_v7  ;;  %v580_v12 = vld [vmem:[%s777_s4 + $0x2] sm:$0x3] (!%p188_p2) }
   0x8   : > { %s626_s28 = smov (!%p188_p2), 127   ;;  %s627_s29 = smov (!%p188_p2), 113   ;;  %v237_v13 = vld [vmem:[%s777_s4] sm:$0x3] (!%p188_p2)  ;;  %v581_v30 = vld [vmem:[%s777_s4 + $0x4] sm:$0x3] (!%p188_p2) }
   0x9   : > { %s629_s30 = smov (!%p188_p2), 112   ;;  %s630_s6 = smov (!%p188_p2), 111   ;;  %v709_v10 = vsub.s32 (!%p188_p2), 0, %v240_v8  ;;  %v711_v11 = vsub.s32 (!%p188_p2), 1, %v240_v8  ;;  %vm255_vm0 = vcmp.lt.s32.totalorder (!%p188_p2), %v707_v9, 16  ;;  %vm234_vm1 = vcmp.lt.s32.totalorder (!%p188_p2), %v707_v9, 17 }
   0xa   : > { %v582_v31 = vld [vmem:[%s777_s4 + $0x6] sm:$0x3] (!%p188_p2)  ;;  %vm277_vm2 = vcmp.lt.s32.totalorder (!%p188_p2), %v707_v9, 15  ;;  %vm299_vm3 = vcmp.lt.s32.totalorder (!%p188_p2), %v707_v9, 1  ;;  %v583_v40 = vld [vmem:[%s777_s4 + $0xa] sm:$0x3] (!%p188_p2) }
   0xb   : > { %v264_v16 = vrot.slane (!%p188_p2), %v580_v12, %v709_v10  ;;  %v242_v17 = vrot.slane (!%p188_p2), %v237_v13, %v709_v10  ;;  %v246_v18 = vrot.slane (!%p188_p2), %v237_v13, %v711_v11  ;;  %v268_v19 = vrot.slane (!%p188_p2), %v580_v12, %v711_v11  ;;  %v584_v61 = vld [vmem:[%s777_s4 + $0xc] sm:$0x3] (!%p188_p2)  ;;  %v585_v62 = vld [vmem:[%s777_s4 + $0xe] sm:$0x3] (!%p188_p2)  ;;  %v586_v12 = vld [vmem:[%s777_s4 + $0x10] sm:$0x3] (!%p188_p2) }
   0xc   : > { %v286_v36 = vrot.slane (!%p188_p2), %v581_v30, %v709_v10  ;;  %v290_v37 = vrot.slane (!%p188_p2), %v581_v30, %v711_v11  ;;  %v308_v38 = vrot.slane (!%p188_p2), %v582_v31, %v709_v10  ;;  %v312_v39 = vrot.slane (!%p188_p2), %v582_v31, %v711_v11  ;;  %v613_v31 = vld [vmem:[%s774_s1] sm:$0xff] (!%p188_p2)  }
   0xd   : > { %s780_s19 = smov (!%p215_p3, %s571_s19), 1  ;;  %vm321_vm4 = vcmp.lt.s32.totalorder %v707_v9, 127  ;;  %v330_v47 = vrot.slane %v583_v40, %v709_v10  ;;  %v334_v48 = vrot.slane %v583_v40, %v711_v11  ;;  %vm343_vm5 = vcmp.lt.s32.totalorder %v707_v9, 113 }
   0xe   : > { %s592_s20 = sshll.u32 %s780_s19, 4  ;;  %vm365_vm6 = vcmp.lt.s32.totalorder %v707_v9, 112  ;;  %v374_v7 = vrot.slane %v585_v62, %v709_v10  ;;  %v378_v8 = vrot.slane %v585_v62, %v711_v11  ;;  %vm387_vm7 = vcmp.lt.s32.totalorder %v707_v9, 111  ;;  %s593_s10 = sshll.u32 %s780_s19, 5 }
   0xf   : > { %s219_s23 = scalar_lea.vmem %s773_s0, %s592_s20  ;;  %s224_s13 = scalar_lea.vmem %s778_s5, %s593_s10 }
  0x10   : > { %v675_v0 = vld [vmem:[%s219_s23] sm:$0xff]  ;;  %v679_v1 = vld [vmem:[%s219_s23 + $0x8] sm:$0xff] }
  0x11   : > { %251 = vrot.lane.b32.xlu1 %v675_v0, %s622_s24  ;;  %228 = vrot.lane.b32.xlu0 %v675_v0, %s623_s25 }
  0x15   : > { %253 = vrot.lane.b32.xlu1 %v679_v1, %s622_s24  ;;  %230 = vrot.lane.b32.xlu0 %v679_v1, %s623_s25 }
  0x19   : > { %275 = vrot.lane.b32.xlu1 %v679_v1, %s624_s26  ;;  %273 = vrot.lane.b32.xlu0 %v675_v0, %s624_s26 }
  0x1d   : > { %297 = vrot.lane.b32.xlu1 %v679_v1, %s625_s27  ;;  %295 = vrot.lane.b32.xlu0 %v675_v0, %s625_s27 }
  0x21   : > { %319 = vrot.lane.b32.xlu1 %v679_v1, %s626_s28  ;;  %317 = vrot.lane.b32.xlu0 %v675_v0, %s626_s28 }
  0x25   : > { %341 = vrot.lane.b32.xlu1 %v679_v1, %s627_s29  ;;  %339 = vrot.lane.b32.xlu0 %v675_v0, %s627_s29 }
  0x29   : > { %363 = vrot.lane.b32.xlu1 %v679_v1, %s629_s30  ;;  %361 = vrot.lane.b32.xlu0 %v675_v0, %s629_s30 }
  0x2d   : > { %385 = vrot.lane.b32.xlu1 %v679_v1, %s630_s6  ;;  %383 = vrot.lane.b32.xlu0 %v675_v0, %s630_s6 }
  0x31   : > { %485 = vperm.xlu1 %612, %v477_v3   ;;  %480 = vperm.xlu0 %611, %v476_v4  }
  0x35   : > { %496 = vperm.xlu1 %612, %v492_v5   ;;  %501 = vperm.xlu0 %611, %v493_v6   ;;  %v352_v5 = vrot.slane %v584_v61, %v709_v10  ;;  %v356_v6 = vrot.slane %v584_v61, %v711_v11 }
  0x83   : > { %v252_v14 = vpop.permute.xlu1 %251  ;;  %v229_v15 = vpop.permute.xlu0 %228 }
  0x87   : > { %v254_v20 = vpop.permute.xlu1 %253  ;;  %v231_v21 = vpop.permute.xlu0 %230 }
  0x88   : > { %v256_v22 = vsel %vm255_vm0, %v252_v14, %v254_v20  ;;  %v257_v23 = vsel %vm255_vm0, %v254_v20, %v252_v14  ;;  %v235_v24 = vsel %vm234_vm1, %v229_v15, %v231_v21  ;;  %v236_v25 = vsel %vm234_vm1, %v231_v21, %v229_v15 }
  0x89   : > { %v271_v26 = vmul.f32 %v264_v16, %v257_v23  ;;  %v249_v27 = vmul.f32 %v242_v17, %v236_v25  ;;  %v250_v28 = vmul.f32 %v246_v18, %v235_v24  ;;  %v272_v29 = vmul.f32 %v268_v19, %v256_v22 }
  0x8a   : > { %v396_v17 = vrot.slane %v586_v12, %v709_v10  ;;  %v400_v18 = vrot.slane %v586_v12, %v711_v11 }
  0x8b   : > { %v276_v32 = vpop.permute.xlu1 %275  ;;  %v274_v33 = vpop.permute.xlu0 %273  ;;  %v406_v34 = vpack.c.bf16 %v272_v29, %v250_v28  ;;  %v405_v35 = vpack.c.bf16 %v271_v26, %v249_v27 }
  0x8c   : > { %v278_v41 = vsel %vm277_vm2, %v274_v33, %v276_v32  ;;  %v279_v42 = vsel %vm277_vm2, %v276_v32, %v274_v33 }
  0x8d   : > { %433 = vmatprep.subr.bf16.mxu0 %v406_v34  ;;  %v293_v49 = vmul.f32 %v286_v36, %v279_v42  ;;  %v294_v50 = vmul.f32 %v290_v37, %v278_v41 }
  0x8e   : > { %434 = vmatpush1.bf16.msra.mxu0 %v405_v35 }
  0x8f   : > { %v298_v43 = vpop.permute.xlu1 %297  ;;  %v296_v44 = vpop.permute.xlu0 %295 }
  0x90   : > { %v300_v45 = vsel %vm299_vm3, %v296_v44, %v298_v43  ;;  %v301_v46 = vsel %vm299_vm3, %v298_v43, %v296_v44 }
  0x91   : > { %v315_v51 = vmul.f32 %v308_v38, %v301_v46  ;;  %v316_v52 = vmul.f32 %v312_v39, %v300_v45 }
  0x93   : > { %v320_v53 = vpop.permute.xlu1 %319  ;;  %v318_v54 = vpop.permute.xlu0 %317  ;;  %v408_v55 = vpack.c.bf16 %v316_v52, %v294_v50  ;;  %v407_v56 = vpack.c.bf16 %v315_v51, %v293_v49 }
  0x94   : > { %v322_v57 = vsel %vm321_vm4, %v318_v54, %v320_v53  ;;  %v323_v58 = vsel %vm321_vm4, %v320_v53, %v318_v54 }
  0x95   : > { %v337_v59 = vmul.f32 %v330_v47, %v322_v57  ;;  %v338_v60 = vmul.f32 %v334_v48, %v323_v58  ;;  %435 = vmatprep.subr.bf16.mxu0 %v408_v55 }
  0x96   : > { %436 = vmatpush1.bf16.msra.mxu0 %v407_v56 }
  0x97   : > { %v342_v63 = vpop.permute.xlu1 %341  ;;  %v340_v2 = vpop.permute.xlu0 %339  ;;  %v410_v3 = vpack.c.bf16 %v338_v60, %v679_v1  ;;  %v409_v4 = vpack.c.bf16 %v337_v59, %v675_v0 }
  0x98   : > { %v344_v13 = vsel %vm343_vm5, %v340_v2, %v342_v63  ;;  %v345_v14 = vsel %vm343_vm5, %v342_v63, %v340_v2 }
  0x99   : > { %437 = vmatprep.subr.bf16.mxu0 %v410_v3  ;;  %v359_v19 = vmul.f32 %v352_v5, %v344_v13  ;;  %v360_v20 = vmul.f32 %v356_v6, %v345_v14 }
  0x9a   : > { %438 = vmatpush1.bf16.msra.mxu0 %v409_v4 }
  0x9b   : > { %v364_v1 = vpop.permute.xlu1 %363  ;;  %v362_v0 = vpop.permute.xlu0 %361 }
  0x9c   : > { %v366_v15 = vsel %vm365_vm6, %v362_v0, %v364_v1  ;;  %v367_v16 = vsel %vm365_vm6, %v364_v1, %v362_v0 }
  0x9d   : > { %v381_v21 = vmul.f32 %v374_v7, %v366_v15  ;;  %v382_v22 = vmul.f32 %v378_v8, %v367_v16 }
  0x9f   : > { %v386_v23 = vpop.permute.xlu1 %385  ;;  %v384_v24 = vpop.permute.xlu0 %383  ;;  %v412_v25 = vpack.c.bf16 %v382_v22, %v360_v20  ;;  %v411_v26 = vpack.c.bf16 %v381_v21, %v359_v19 }
  0xa0   : > { %v388_v27 = vsel %vm387_vm7, %v384_v24, %v386_v23  ;;  %v389_v28 = vsel %vm387_vm7, %v386_v23, %v384_v24 }
  0xa1   : > { %v403_v29 = vmul.f32 %v396_v17, %v388_v27  ;;  %v404_v30 = vmul.f32 %v400_v18, %v389_v28  ;;  %439 = vmatprep.subr.bf16.mxu0 %v412_v25 }
  0xa2   : > { %440 = vmatpush1.bf16.msra.mxu0 %v411_v26 }
  0xa3   : > { %v413_v9 = vpack.c.bf16 %v403_v29, %v403_v29  ;;  %v414_v10 = vpack.c.bf16 %v404_v30, %v404_v30 }
  0xa5   : > { %588 = vmatprep.subr.msk.bf16.mxu0 %vm426_vm8, %v414_v10  ;;  %v428_v11 = vsel %vm426_vm8, %v413_v9, 0 }
  0xa6   : > { %442 = vmatpush1.bf16.msra.mxu0 %v428_v11 }
  0xa9   : > { %589 = vmatmul.mubr.msk.bf16.vlgmr.msra.gmra.mrb[0].mxu0 %vm422_vm9, %v613_v31 }
  0xb0   : > { %v486_v32 = vpop.permute.xlu1 %485  ;;  %v481_v33 = vpop.permute.xlu0 %480 }
  0xb4   : > { %v497_v35 = vpop.permute.xlu1 %496  ;;  %v502_v44 = vpop.permute.xlu0 %501 }
 0x17c   : > { %v467_v34 = vpop.f32.mrb[0].mxu0 }
 0x17d   : > { %v488_v36 = vmul.f32 %v481_v33, %v467_v34  ;;  %v469_v37 = vpop.f32.mrb[1].mxu0 }
 0x17e   : > { %v489_v38 = vmul.f32 %v481_v33, %v469_v37  ;;  %v471_v39 = vpop.f32.mrb[2].mxu0 }
 0x17f   : > { %v504_v40 = vadd.f32 %v497_v35, %v488_v36  ;;  %v490_v41 = vmul.f32 %v486_v32, %v471_v39  ;;  %v473_v42 = vpop.f32.mrb[3].mxu0 }
 0x180   : > { %v505_v43 = vadd.f32 %v497_v35, %v489_v38  ;;  %v491_v45 = vmul.f32 %v486_v32, %v473_v42 }
 0x181   : > { %v508_v46 = vmax.f32 %v504_v40, 0.0  ;;  %v506_v47 = vadd.f32 %v502_v44, %v490_v41 }
 0x182   : > { %v509_v48 = vmax.f32 %v505_v43, 0.0  ;;  %v507_v49 = vadd.f32 %v502_v44, %v491_v45 }
 0x183   : > { %512 = vst [vmem:[%s224_s13] sm:$0xff] %v508_v46  ;;  %v510_v50 = vmax.f32 %v506_v47, 0.0 }
 0x184   : > { %513 = vst [vmem:[%s224_s13 + $0x8] sm:$0xff] %v509_v48  ;;  %v511_v51 = vmax.f32 %v507_v49, 0.0 }
 0x185   : > { %514 = vst [vmem:[%s224_s13 + $0x10] sm:$0xff] %v510_v50 }
 0x186   : > { %515 = vst [vmem:[%s224_s13 + $0x18] sm:$0xff] %v511_v51 }
 0x187 PF: > { %s15_s18 = sadd.s32 1, %s620_s18  }
 0x188   : > { %p12_p4 = scmp.ge.s32.totalorder %s15_s18, 4  }
 0x18a   :  { %14 = sbr.rel (!%p12_p4) target bundleno = 1 (0x1), region = 77 }

</bundles_post_ra>
